<compile_context>
chip_gen: v6e
topology: v6e:2x2x1
jax: 0.10.0
libtpu: 0.0.40
codegen_flags: <defaults>
</compile_context>

<pallas_src>
import math

import jax
import jax.numpy as jnp
from jax.experimental import pallas as pl
from jax.experimental.pallas import tpu as pltpu


def _make_dma_concat_kernel(multiple, slab):
    """Build a kernel that replicates the (outer, slab) input `multiple` times
    along the output's trailing axis using only HBM->HBM async DMAs."""

    def kernel(x_hbm, o_hbm, sems):
        # Issue all replica copies first (they run concurrently on the DMA
        # engines), then wait on every semaphore.
        for r in range(multiple):
            pltpu.make_async_copy(
                x_hbm, o_hbm.at[:, pl.ds(r * slab, slab)], sems.at[r]
            ).start()
        for r in range(multiple):
            pltpu.make_async_copy(
                x_hbm, o_hbm.at[:, pl.ds(r * slab, slab)], sems.at[r]
            ).wait()

    return kernel


def copy_channels_pallas(x, multiple=3, dim=1):
    """Pallas equivalent of torch.cat([x] * multiple, dim=dim)."""
    if multiple == 1:
        return x

    dim = dim % x.ndim
    axis_len = x.shape[dim]
    outer = math.prod(x.shape[:dim])
    inner = math.prod(x.shape[dim + 1:])
    slab = axis_len * inner  # contiguous elements per (outer-row, replica) slab
    final_shape = x.shape[:dim] + (multiple * axis_len,) + x.shape[dim + 1:]

    itemsize = jnp.dtype(x.dtype).itemsize

    # Contiguous (free) 2-D view around the concat axis.
    x2 = x.reshape(outer, slab)

    out2 = pl.pallas_call(
        _make_dma_concat_kernel(multiple, slab),
        out_shape=jax.ShapeDtypeStruct((outer, multiple * slab), x.dtype),
        in_specs=[pl.BlockSpec(memory_space=pl.ANY)],
        out_specs=pl.BlockSpec(memory_space=pl.ANY),
        scratch_shapes=[pltpu.SemaphoreType.DMA((multiple,))],
        cost_estimate=pl.CostEstimate(
            flops=0,
            transcendentals=0,
            bytes_accessed=(1 + multiple) * x.size * itemsize,
        ),
    )(x2)

    # Contiguous (free) reshape back to the concatenated shape; the flat
    # layout matches torch.cat's [copy0 | copy1 | ...] ordering along `dim`.
    return out2.reshape(final_shape)


class CopyChannels:
    """Mirror of the PyTorch module: CopyChannels(multiple, dim)(x)."""

    def __init__(self, multiple=3, dim=1):
        self.multiple = multiple
        self.dim = dim

    def __call__(self, x):
        return copy_channels_pallas(x, self.multiple, self.dim)


if __name__ == "__main__":
    key = jax.random.PRNGKey(0)
    # NCHW input: batch=2, channels=4, spatial=16x16.
    x = jax.random.normal(key, (2, 4, 16, 16), dtype=jnp.float32)

    module = CopyChannels(multiple=3, dim=1)
    out = jax.block_until_ready(module(x))
    ref = jnp.concatenate([x, x, x], axis=1)
    assert out.shape == ref.shape, (out.shape, ref.shape)
    assert out.dtype == ref.dtype
    assert jnp.array_equal(out, ref), "Pallas CopyChannels mismatch (dim=1)"

    # Non-default concat axes exercise the same dim-agnostic DMA path.
    out2 = jax.block_until_ready(CopyChannels(multiple=2, dim=2)(x))
    ref2 = jnp.concatenate([x, x], axis=2)
    assert jnp.array_equal(out2, ref2), "Pallas CopyChannels mismatch (dim=2)"

    out3 = jax.block_until_ready(CopyChannels(multiple=2, dim=-1)(x))
    ref3 = jnp.concatenate([x, x], axis=-1)
    assert jnp.array_equal(out3, ref3), "Pallas CopyChannels mismatch (dim=-1)"

    out0 = jax.block_until_ready(CopyChannels(multiple=3, dim=0)(x))
    ref0 = jnp.concatenate([x, x, x], axis=0)
    assert jnp.array_equal(out0, ref0), "Pallas CopyChannels mismatch (dim=0)"

    print("KERNEL_OK")
</pallas_src>

<mosaic_0001>
module attributes {stable_mosaic.version = 11 : i64} {
  func.func @kernel(%arg0: memref<2x1024xf32, #tpu.memory_space<any>>, %arg1: memref<2x3072xf32, #tpu.memory_space<any>>, %arg2: memref<3x!tpu.dma_semaphore, #tpu.memory_space<semaphore_mem>>) attributes {dimension_semantics = [], scalar_prefetch = 0 : i64, scratch_operands = 1 : i64, tpu.core_type = #tpu.core_type<tc>} {
    %c0_i32 = arith.constant 0 : i32
    %c0_i32_0 = arith.constant 0 : i32
    %c0_i32_1 = arith.constant 0 : i32
    %0 = tpu.memref_slice %arg1[%c0_i32_0, %c0_i32_1] : memref<2x3072xf32, #tpu.memory_space<any>> -> memref<2x1024xf32, #tpu.memory_space<any>>
    %1 = tpu.memref_slice %arg2[%c0_i32] : memref<3x!tpu.dma_semaphore, #tpu.memory_space<semaphore_mem>> -> memref<1x!tpu.dma_semaphore, #tpu.memory_space<semaphore_mem>>
    %2 = tpu.memref_squeeze %1 : memref<1x!tpu.dma_semaphore, #tpu.memory_space<semaphore_mem>> -> memref<!tpu.dma_semaphore, #tpu.memory_space<semaphore_mem>>
    tpu.enqueue_dma source(%arg0 : memref<2x1024xf32, #tpu.memory_space<any>>) target(%0 : memref<2x1024xf32, #tpu.memory_space<any>>) target_semaphore(%2 : memref<!tpu.dma_semaphore, #tpu.memory_space<semaphore_mem>>)
    %c1_i32 = arith.constant 1 : i32
    %c0_i32_2 = arith.constant 0 : i32
    %c1024_i32 = arith.constant 1024 : i32
    %3 = tpu.memref_slice %arg1[%c0_i32_2, %c1024_i32] : memref<2x3072xf32, #tpu.memory_space<any>> -> memref<2x1024xf32, #tpu.memory_space<any>>
    %4 = tpu.memref_slice %arg2[%c1_i32] : memref<3x!tpu.dma_semaphore, #tpu.memory_space<semaphore_mem>> -> memref<1x!tpu.dma_semaphore, #tpu.memory_space<semaphore_mem>>
    %5 = tpu.memref_squeeze %4 : memref<1x!tpu.dma_semaphore, #tpu.memory_space<semaphore_mem>> -> memref<!tpu.dma_semaphore, #tpu.memory_space<semaphore_mem>>
    tpu.enqueue_dma source(%arg0 : memref<2x1024xf32, #tpu.memory_space<any>>) target(%3 : memref<2x1024xf32, #tpu.memory_space<any>>) target_semaphore(%5 : memref<!tpu.dma_semaphore, #tpu.memory_space<semaphore_mem>>)
    %c2_i32 = arith.constant 2 : i32
    %c0_i32_3 = arith.constant 0 : i32
    %c2048_i32 = arith.constant 2048 : i32
    %6 = tpu.memref_slice %arg1[%c0_i32_3, %c2048_i32] : memref<2x3072xf32, #tpu.memory_space<any>> -> memref<2x1024xf32, #tpu.memory_space<any>>
    %7 = tpu.memref_slice %arg2[%c2_i32] : memref<3x!tpu.dma_semaphore, #tpu.memory_space<semaphore_mem>> -> memref<1x!tpu.dma_semaphore, #tpu.memory_space<semaphore_mem>>
    %8 = tpu.memref_squeeze %7 : memref<1x!tpu.dma_semaphore, #tpu.memory_space<semaphore_mem>> -> memref<!tpu.dma_semaphore, #tpu.memory_space<semaphore_mem>>
    tpu.enqueue_dma source(%arg0 : memref<2x1024xf32, #tpu.memory_space<any>>) target(%6 : memref<2x1024xf32, #tpu.memory_space<any>>) target_semaphore(%8 : memref<!tpu.dma_semaphore, #tpu.memory_space<semaphore_mem>>)
    %c0_i32_4 = arith.constant 0 : i32
    %c0_i32_5 = arith.constant 0 : i32
    %c0_i32_6 = arith.constant 0 : i32
    %9 = tpu.memref_slice %arg1[%c0_i32_5, %c0_i32_6] : memref<2x3072xf32, #tpu.memory_space<any>> -> memref<2x1024xf32, #tpu.memory_space<any>>
    %10 = tpu.memref_slice %arg2[%c0_i32_4] : memref<3x!tpu.dma_semaphore, #tpu.memory_space<semaphore_mem>> -> memref<1x!tpu.dma_semaphore, #tpu.memory_space<semaphore_mem>>
    %11 = tpu.memref_squeeze %10 : memref<1x!tpu.dma_semaphore, #tpu.memory_space<semaphore_mem>> -> memref<!tpu.dma_semaphore, #tpu.memory_space<semaphore_mem>>
    tpu.wait_dma2 semaphore(%11 : memref<!tpu.dma_semaphore, #tpu.memory_space<semaphore_mem>>) src(%arg0 : memref<2x1024xf32, #tpu.memory_space<any>>) dst(%9 : memref<2x1024xf32, #tpu.memory_space<any>>)
    %c1_i32_7 = arith.constant 1 : i32
    %c0_i32_8 = arith.constant 0 : i32
    %c1024_i32_9 = arith.constant 1024 : i32
    %12 = tpu.memref_slice %arg1[%c0_i32_8, %c1024_i32_9] : memref<2x3072xf32, #tpu.memory_space<any>> -> memref<2x1024xf32, #tpu.memory_space<any>>
    %13 = tpu.memref_slice %arg2[%c1_i32_7] : memref<3x!tpu.dma_semaphore, #tpu.memory_space<semaphore_mem>> -> memref<1x!tpu.dma_semaphore, #tpu.memory_space<semaphore_mem>>
    %14 = tpu.memref_squeeze %13 : memref<1x!tpu.dma_semaphore, #tpu.memory_space<semaphore_mem>> -> memref<!tpu.dma_semaphore, #tpu.memory_space<semaphore_mem>>
    tpu.wait_dma2 semaphore(%14 : memref<!tpu.dma_semaphore, #tpu.memory_space<semaphore_mem>>) src(%arg0 : memref<2x1024xf32, #tpu.memory_space<any>>) dst(%12 : memref<2x1024xf32, #tpu.memory_space<any>>)
    %c2_i32_10 = arith.constant 2 : i32
    %c0_i32_11 = arith.constant 0 : i32
    %c2048_i32_12 = arith.constant 2048 : i32
    %15 = tpu.memref_slice %arg1[%c0_i32_11, %c2048_i32_12] : memref<2x3072xf32, #tpu.memory_space<any>> -> memref<2x1024xf32, #tpu.memory_space<any>>
    %16 = tpu.memref_slice %arg2[%c2_i32_10] : memref<3x!tpu.dma_semaphore, #tpu.memory_space<semaphore_mem>> -> memref<1x!tpu.dma_semaphore, #tpu.memory_space<semaphore_mem>>
    %17 = tpu.memref_squeeze %16 : memref<1x!tpu.dma_semaphore, #tpu.memory_space<semaphore_mem>> -> memref<!tpu.dma_semaphore, #tpu.memory_space<semaphore_mem>>
    tpu.wait_dma2 semaphore(%17 : memref<!tpu.dma_semaphore, #tpu.memory_space<semaphore_mem>>) src(%arg0 : memref<2x1024xf32, #tpu.memory_space<any>>) dst(%15 : memref<2x1024xf32, #tpu.memory_space<any>>)
    return
  }
}

</mosaic_0001>

<bundles_post_ra>
// kernel: tpu_custom_call.1
= control target key start
LH: loop header
LB: loop body
LE: loop exit
PB: predicated region body
PF: predicated region fallthrough
CT: control target
= control target key end

     0   :  { %s73_s9 = smov [#allocation2]   ;;  %s74_s10 = smov 131072   ;;  %s106_s0 = inlined_call_operand.hbm [shape: f32[2,1024], index: 0, kind: input, shape index: {}]   ;;  %s107_s1 = inlined_call_operand.hbm [shape: f32[2,3072], index: 1, kind: output, shape index: {}]  }
   0x1   :  { %s13_s8 = scalar_lea.hbm %s107_s1, 256  ;;  %s75_s11 = smov 0  }
   0x2   :  { %12 = dma.general %s106_s0, 256, %s107_s1, %s73_s9, %s74_s10, [#allocation4], %s75_s11, 0  }
   0x3   :  { %s22_s18 = scalar_lea.hbm %s107_s1, 512  ;;  %s76_s19 = smov [#allocation2 + $0x1]  }
   0x4   :  { %21 = dma.general %s106_s0, 256, %s13_s8, %s76_s19, %s74_s10, [#allocation6], %s75_s11, 0  }
   0x5   :  { %s77_s22 = smov [#allocation2 + $0x2]  }
   0x6   :  { %30 = dma.general %s106_s0, 256, %s22_s18, %s77_s22, %s74_s10, [#allocation8], %s75_s11, 0  }
   0x7   :  { %67 = dma.done.wait [#allocation2], 256 }
   0x8   :  { %68 = vsyncadd [#allocation2], 4294967040 }
   0x9   :  { %69 = dma.done.wait [#allocation2 + $0x1], 256 }
   0xa   :  { %70 = vsyncadd [#allocation2 + $0x1], 4294967040 }
   0xb   :  { %71 = dma.done.wait [#allocation2 + $0x2], 256 }
   0xc   :  { %72 = vsyncadd [#allocation2 + $0x2], 4294967040 }
   0xd   :  { %39 = vsyncmov [#allocation2] }
  0x10   :  { %s40_s25 = vpop.sfrf %39 }
  0x11   :  { %p59_p0 = scmp.ne.s32.totalorder %s40_s25, 0 }
  0x13   :  { %44 = shalt.err (%p59_p0)  }
  0x14   :  { %46 = vsyncmov [#allocation2 + $0x1] }
  0x17   :  { %s47_s1 = vpop.sfrf %46 }
  0x18   :  { %p60_p1 = scmp.ne.s32.totalorder %s47_s1, 0 }
  0x1a   :  { %51 = shalt.err (%p60_p1)  }
  0x1b   :  { %53 = vsyncmov [#allocation2 + $0x2] }
  0x1e   :  { %s54_s26 = vpop.sfrf %53 }
  0x1f   :  { %p61_p2 = scmp.ne.s32.totalorder %s54_s26, 0 }
  0x21   :  { %58 = shalt.err (%p61_p2)  }

</bundles_post_ra>
